<compile_context>
chip_gen: v7x
topology: tpu7x:2x2x1
jax: 0.10.0
libtpu: 0.0.40
codegen_flags: <defaults>
</compile_context>

<pallas_src>
import math
import functools

import jax
import jax.numpy as jnp
from jax import lax
from jax.experimental import pallas as pl
from jax.experimental.pallas import tpu as pltpu


def _cdiv(a, b):
    return -(-a // b)


def _round_up(x, k):
    return _cdiv(x, k) * k


def _pick_tile(size, align, target):
    """Tile (multiple of `align`, close to `target`) + padded total it divides."""
    aligned = _round_up(max(size, 1), align)
    n_blocks = max(1, _cdiv(aligned, target))
    tile = _round_up(_cdiv(aligned, n_blocks), align)
    return tile, n_blocks * tile


def arcface_kernel(hit_ref, label_ref, x_ref, wt_ref, o_ref, inv_ref, *,
                   cos_m, sin_m, s, s_th, s_mm, tn):
    # hit_ref:  (nb, nc) int32 in SMEM (scalar prefetch)
    # label_ref:(tm, 1) int32, x_ref: (tm, E) bf16, wt_ref: (E, tn) bf16
    # o_ref:    (tm, tn),  inv_ref: (1, tn) f32 scratch (s / ||w_col||)
    j = pl.program_id(0)          # column (class) block
    i = pl.program_id(1)          # row (batch) block

    # Per-class scale s/||w||, computed once per column block; the W^T tile and
    # this scratch stay resident across the whole inner batch sweep.
    @pl.when(i == 0)
    def _():
        w32 = wt_ref[...].astype(jnp.float32)
        nrm = jnp.sqrt(jnp.sum(w32 * w32, axis=0, keepdims=True))   # (1, tn)
        inv_ref[...] = s / jnp.maximum(nrm, 1e-12)

    # s * cosine = s * (x @ w^T) / ||w||   (bf16 MXU feed, f32 accumulate).
    cos_s = jnp.dot(x_ref[...], wt_ref[...],
                    preferred_element_type=jnp.float32) * inv_ref[...]

    block_has_label = hit_ref[i, j] > 0

    @pl.when(block_has_label)
    def _():
        # s*sine = sqrt(clamp(s^2 - (s*cos)^2, 0, s^2))
        sine_s = jnp.sqrt(jnp.clip(s * s - cos_s * cos_s, 0.0, s * s))
        phi_s = cos_s * cos_m - sine_s * sin_m            # s * cos(theta + m)
        phi_s = jnp.where(cos_s > s_th, phi_s, cos_s - s_mm)
        col_ids = j * tn + lax.broadcasted_iota(jnp.int32, cos_s.shape, 1)
        one_hot = col_ids == label_ref[...]               # (tm,1) -> (tm,tn)
        o_ref[...] = jnp.where(one_hot, phi_s, cos_s).astype(o_ref.dtype)

    @pl.when(jnp.logical_not(block_has_label))
    def _():
        o_ref[...] = cos_s.astype(o_ref.dtype)


def prepare_arcface_weight(weight, *, tn_target=2048, matmul_dtype=jnp.bfloat16):
    """One-time weight prep: (C, E) f32 -> padded, transposed (E, Cp) bf16."""
    C, _ = weight.shape
    tn, Cp = _pick_tile(C, 128, tn_target)
    w_t = weight.astype(matmul_dtype).T                   # (E, C), lane-dense C
    if Cp != C:
        w_t = jnp.pad(w_t, ((0, 0), (0, Cp - C)))
    return w_t, tn


def arcface_head(x, w_t, label, num_classes, *, tn, s=64.0, m=0.5,
                 tm_target=256, matmul_dtype=jnp.bfloat16,
                 out_dtype=jnp.float32):
    B, E = x.shape
    E_w, Cp = w_t.shape
    assert E == E_w and Cp % tn == 0
    C = num_classes

    tm, Bp = _pick_tile(B, 16, tm_target)
    nb, nc = Bp // tm, Cp // tn

    x_m = x.astype(matmul_dtype)
    lab = label.astype(jnp.int32)
    if Bp != B:
        x_m = jnp.pad(x_m, ((0, Bp - B), (0, 0)))
        lab = jnp.pad(lab, (0, Bp - B), constant_values=-1)
    label2d = lab.reshape(Bp, 1)

    # (nb, nc) block-hit table (scalar-prefetched to SMEM): which output blocks
    # contain at least one label and therefore need the margin epilogue.
    row_blk = jnp.arange(Bp, dtype=jnp.int32) // tm
    col_blk = jnp.clip(lab, 0, Cp - 1) // tn
    hit = jnp.zeros((nb, nc), jnp.int32).at[row_blk, col_blk].max(
        (lab >= 0).astype(jnp.int32))

    kernel = functools.partial(
        arcface_kernel,
        cos_m=math.cos(m), sin_m=math.sin(m), s=float(s),
        s_th=float(s) * math.cos(math.pi - m),
        s_mm=float(s) * math.sin(math.pi - m) * m,
        tn=tn)

    in_bytes = jnp.dtype(matmul_dtype).itemsize
    out_bytes = jnp.dtype(out_dtype).itemsize
    tile_bytes = (2 * (tm * E * in_bytes + E * tn * in_bytes
                       + tm * tn * out_bytes + tm * 4) + tn * 4)
    # Cap under v7x's 64 MiB VMEM (leave headroom for Mosaic internal scratch).
    vmem_limit = int(min(max(2 * tile_bytes, 16 << 20), 44 << 20))

    cost = pl.CostEstimate(
        flops=2 * Bp * Cp * E,
        transcendentals=Bp * Cp,
        bytes_accessed=int(E * Cp * in_bytes + nc * Bp * E * in_bytes
                           + Bp * Cp * out_bytes + nc * Bp * 4))

    out = pl.pallas_call(
        kernel,
        out_shape=jax.ShapeDtypeStruct((Bp, Cp), out_dtype),
        grid_spec=pltpu.PrefetchScalarGridSpec(
            num_scalar_prefetch=1,
            grid=(nc, nb),                      # batch innermost: each W^T tile
            in_specs=[                          # is streamed from HBM once
                pl.BlockSpec((tm, 1), lambda j, i, hit: (i, 0)),   # labels
                pl.BlockSpec((tm, E), lambda j, i, hit: (i, 0)),   # x (bf16)
                pl.BlockSpec((E, tn), lambda j, i, hit: (0, j)),   # W^T (bf16)
            ],
            out_specs=pl.BlockSpec((tm, tn), lambda j, i, hit: (i, j)),
            scratch_shapes=[pltpu.VMEM((1, tn), jnp.float32)],
        ),
        compiler_params=pltpu.CompilerParams(
            dimension_semantics=("parallel", "arbitrary"),
            vmem_limit_bytes=vmem_limit),
        cost_estimate=cost,
    )(hit, label2d, x_m, w_t)

    if Bp != B or Cp != C:
        out = out[:B, :C]
    return out


def arcface_reference(x, weight, label, *, s=64.0, m=0.5,
                      matmul_dtype=jnp.bfloat16, return_cosine=False):
    """Plain-JAX replica of the PyTorch forward; the matmul uses the same
    bf16 operand precision as the kernel's MXU feed (apples-to-apples)."""
    w_m = weight.astype(matmul_dtype)
    inv = 1.0 / jnp.maximum(
        jnp.linalg.norm(w_m.astype(jnp.float32), axis=1), 1e-12)
    cosine = jnp.dot(x.astype(matmul_dtype), w_m.T,
                     preferred_element_type=jnp.float32) * inv
    sine = jnp.sqrt(jnp.clip(1.0 - cosine ** 2, 0.0, 1.0))
    phi = cosine * math.cos(m) - sine * math.sin(m)
    phi = jnp.where(cosine > math.cos(math.pi - m),
                    phi, cosine - math.sin(math.pi - m) * m)
    one_hot = jax.nn.one_hot(label, weight.shape[0], dtype=cosine.dtype)
    out = (one_hot * phi + (1.0 - one_hot) * cosine) * s
    return (out, cosine) if return_cosine else out


def _assert_close(out, x, weight, label, *, s=64.0, m=0.5):
    ref, cosine = arcface_reference(x, weight, label, s=s, m=m,
                                    return_cosine=True)
    # Elements whose cosine sits exactly at the margin threshold may take a
    # different branch under matmul-order rounding; exclude those few.
    borderline = jnp.abs(cosine - math.cos(math.pi - m)) < 1e-3
    ok = jnp.abs(out - ref) <= 3e-2 + 3e-3 * jnp.abs(ref)
    assert bool(jnp.all(ok | borderline)), float(jnp.max(jnp.abs(out - ref)))


if __name__ == "__main__":
    # Small shapes consistent with the module (embedding_size=128 default);
    # B and C intentionally NOT tile multiples to exercise padding, and
    # tn_target=128 so there are several column blocks (hit and no-hit paths).
    B, E, C = 10, 128, 300
    key = jax.random.PRNGKey(0)
    k_x, k_w, k_l = jax.random.split(key, 3)

    x = jax.random.normal(k_x, (B, E), dtype=jnp.float32)
    bound = math.sqrt(6.0 / (C + E))                       # xavier_uniform_
    weight = jax.random.uniform(k_w, (C, E), dtype=jnp.float32,
                                minval=-bound, maxval=bound)
    label = jax.random.randint(k_l, (B,), 0, C, dtype=jnp.int32)

    # One-time weight preparation (transpose + pad + bf16 cast).
    w_t, tn = prepare_arcface_weight(weight, tn_target=128)

    # Case 1: labels spread over the class range.
    out = arcface_head(x, w_t, label, num_classes=C, tn=tn)
    out = jax.block_until_ready(out)
    assert out.shape == (B, C)
    _assert_close(out, x, weight, label)

    # Case 2: all labels in block 0 -> other column blocks take the
    # no-hit (epilogue-skipped) path.
    label0 = jnp.zeros((B,), dtype=jnp.int32)
    out0 = jax.block_until_ready(
        arcface_head(x, w_t, label0, num_classes=C, tn=tn))
    _assert_close(out0, x, weight, label0)

    print("KERNEL_OK")
</pallas_src>

<mosaic_0001>
module attributes {stable_mosaic.version = 11 : i64} {
  func.func @arcface_kernel(%arg0: i32, %arg1: i32, %arg2: memref<1x3xi32, #tpu.memory_space<smem>>, %arg3: memref<16x1xi32, #tpu.memory_space<vmem>>, %arg4: memref<16x128xbf16, #tpu.memory_space<vmem>>, %arg5: memref<128x128xbf16, #tpu.memory_space<vmem>>, %arg6: memref<16x128xf32, #tpu.memory_space<vmem>>, %arg7: memref<1x128xf32, #tpu.memory_space<vmem>>) attributes {dimension_semantics = [#tpu.dimension_semantics<parallel>, #tpu.dimension_semantics<arbitrary>], iteration_bounds = array<i64: 3, 1>, scalar_prefetch = 1 : i64, scratch_operands = 1 : i64, tpu.core_type = #tpu.core_type<tc>, window_params = [{transform_indices = @transform_0, window_bounds = array<i64: 16, 1>}, {transform_indices = @transform_1, window_bounds = array<i64: 16, 128>}, {transform_indices = @transform_2, window_bounds = array<i64: 128, 128>}, {transform_indices = @transform_3, window_bounds = array<i64: 16, 128>}]} {
    %c0_i32 = arith.constant 0 : i32
    %0 = arith.cmpi eq, %arg1, %c0_i32 : i32
    %1 = arith.extui %0 : i1 to i32
    %c0_i32_0 = arith.constant 0 : i32
    %2 = arith.cmpi ne, %1, %c0_i32_0 : i32
    scf.if %2 {
      %c0_9 = arith.constant 0 : index
      %c0_10 = arith.constant 0 : index
      %18 = vector.load %arg5[%c0_9, %c0_10] : memref<128x128xbf16, #tpu.memory_space<vmem>>, vector<128x128xbf16>
      %19 = arith.extf %18 : vector<128x128xbf16> to vector<128x128xf32>
      %20 = arith.mulf %19, %19 : vector<128x128xf32>
      %cst_11 = arith.constant dense<0.000000e+00> : vector<128xf32>
      %21 = vector.multi_reduction <add>, %20, %cst_11 [0] : vector<128x128xf32> to vector<128xf32>
      %22 = vector.shape_cast %21 : vector<128xf32> to vector<1x128xf32>
      %23 = math.sqrt %22 : vector<1x128xf32>
      %cst_12 = arith.constant 9.99999996E-13 : f32
      %24 = vector.broadcast %cst_12 : f32 to vector<1x128xf32>
      %25 = arith.maximumf %23, %24 : vector<1x128xf32>
      %cst_13 = arith.constant 6.400000e+01 : f32
      %26 = vector.broadcast %cst_13 : f32 to vector<1x128xf32>
      %27 = arith.divf %26, %25 : vector<1x128xf32>
      %c0_14 = arith.constant 0 : index
      %c0_15 = arith.constant 0 : index
      %28 = vector.load %arg7[%c0_14, %c0_15] : memref<1x128xf32, #tpu.memory_space<vmem>>, vector<1x128xf32>
      tpu.vector_store %arg7[%c0_14, %c0_15], %27 {strides = array<i32>} : memref<1x128xf32, #tpu.memory_space<vmem>>, vector<1x128xf32>,
    } else {
    }
    %c0 = arith.constant 0 : index
    %c0_1 = arith.constant 0 : index
    %3 = vector.load %arg4[%c0, %c0_1] : memref<16x128xbf16, #tpu.memory_space<vmem>>, vector<16x128xbf16>
    %c0_2 = arith.constant 0 : index
    %c0_3 = arith.constant 0 : index
    %4 = vector.load %arg5[%c0_2, %c0_3] : memref<128x128xbf16, #tpu.memory_space<vmem>>, vector<128x128xbf16>
    %cst = arith.constant dense<0.000000e+00> : vector<16x128xf32>
    %5 = tpu.matmul %3, %4, %cst {dimension_numbers = #tpu.dot_dimension_numbers<[1], [0], [0], [1], [0, 0, 1, 1], [], []>} : vector<16x128xbf16>, vector<128x128xbf16>, vector<16x128xf32> -> vector<16x128xf32>
    %c0_4 = arith.constant 0 : index
    %c0_5 = arith.constant 0 : index
    %6 = vector.load %arg7[%c0_4, %c0_5] : memref<1x128xf32, #tpu.memory_space<vmem>>, vector<1x128xf32>
    %7 = vector.broadcast %6 : vector<1x128xf32> to vector<16x128xf32>
    %8 = arith.mulf %5, %7 : vector<16x128xf32>
    %9 = arith.index_cast %arg1 : i32 to index
    %10 = arith.index_cast %arg0 : i32 to index
    %11 = memref.load %arg2[%9, %10] : memref<1x3xi32, #tpu.memory_space<smem>>
    %c0_i32_6 = arith.constant 0 : i32
    %12 = arith.cmpi sgt, %11, %c0_i32_6 : i32
    %13 = arith.extui %12 : i1 to i32
    %c0_i32_7 = arith.constant 0 : i32
    %14 = arith.cmpi ne, %13, %c0_i32_7 : i32
    scf.if %14 {
      %18 = arith.mulf %8, %8 : vector<16x128xf32>
      %cst_9 = arith.constant 4.096000e+03 : f32
      %19 = vector.broadcast %cst_9 : f32 to vector<16x128xf32>
      %20 = arith.subf %19, %18 : vector<16x128xf32>
      %cst_10 = arith.constant 0.000000e+00 : f32
      %cst_11 = arith.constant 4.096000e+03 : f32
      %21 = vector.broadcast %cst_10 : f32 to vector<16x128xf32>
      %22 = arith.maximumf %21, %20 : vector<16x128xf32>
      %23 = vector.broadcast %cst_11 : f32 to vector<16x128xf32>
      %24 = arith.minimumf %23, %22 : vector<16x128xf32>
      %25 = math.sqrt %24 : vector<16x128xf32>
      %cst_12 = arith.constant 0.87758255 : f32
      %26 = vector.broadcast %cst_12 : f32 to vector<16x128xf32>
      %27 = arith.mulf %8, %26 : vector<16x128xf32>
      %cst_13 = arith.constant 0.47942555 : f32
      %28 = vector.broadcast %cst_13 : f32 to vector<16x128xf32>
      %29 = arith.mulf %25, %28 : vector<16x128xf32>
      %30 = arith.subf %27, %29 : vector<16x128xf32>
      %cst_14 = arith.constant -56.1652832 : f32
      %31 = vector.broadcast %cst_14 : f32 to vector<16x128xf32>
      %32 = arith.cmpf ogt, %8, %31 : vector<16x128xf32>
      %cst_15 = arith.constant 15.3416176 : f32
      %33 = vector.broadcast %cst_15 : f32 to vector<16x128xf32>
      %34 = arith.subf %8, %33 : vector<16x128xf32>
      %35 = arith.select %32, %30, %34 : vector<16x128xi1>, vector<16x128xf32>
      %c128_i32 = arith.constant 128 : i32
      %36 = arith.muli %arg0, %c128_i32 : i32
      %37 = tpu.iota {dimensions = array<i32: 1>} : vector<16x128xi32>
      %38 = vector.broadcast %36 : i32 to vector<16x128xi32>
      %39 = arith.addi %38, %37 : vector<16x128xi32>
      %c0_16 = arith.constant 0 : index
      %c0_17 = arith.constant 0 : index
      %40 = vector.load %arg3[%c0_16, %c0_17] : memref<16x1xi32, #tpu.memory_space<vmem>>, vector<16x1xi32>
      %41 = vector.broadcast %40 : vector<16x1xi32> to vector<16x128xi32>
      %42 = arith.cmpi eq, %39, %41 : vector<16x128xi32>
      %43 = arith.select %42, %35, %8 : vector<16x128xi1>, vector<16x128xf32>
      %c0_18 = arith.constant 0 : index
      %c0_19 = arith.constant 0 : index
      %44 = vector.load %arg6[%c0_18, %c0_19] : memref<16x128xf32, #tpu.memory_space<vmem>>, vector<16x128xf32>
      tpu.vector_store %arg6[%c0_18, %c0_19], %43 {strides = array<i32>} : memref<16x128xf32, #tpu.memory_space<vmem>>, vector<16x128xf32>,
    } else {
    }
    %true = arith.constant true
    %15 = arith.xori %12, %true : i1
    %16 = arith.extui %15 : i1 to i32
    %c0_i32_8 = arith.constant 0 : i32
    %17 = arith.cmpi ne, %16, %c0_i32_8 : i32
    scf.if %17 {
      %c0_9 = arith.constant 0 : index
      %c0_10 = arith.constant 0 : index
      %18 = vector.load %arg6[%c0_9, %c0_10] : memref<16x128xf32, #tpu.memory_space<vmem>>, vector<16x128xf32>
      tpu.vector_store %arg6[%c0_9, %c0_10], %8 {strides = array<i32>} : memref<16x128xf32, #tpu.memory_space<vmem>>, vector<16x128xf32>,
    } else {
    }
    return
  }
  func.func @transform_0(%arg0: i32, %arg1: i32, %arg2: memref<1x3xi32, #tpu.memory_space<smem>>) -> (i32, i32) {
    %c0_i32 = arith.constant 0 : i32
    %c0_i32_0 = arith.constant 0 : i32
    return %arg1, %c0_i32 : i32, i32
  }
  func.func @transform_1(%arg0: i32, %arg1: i32, %arg2: memref<1x3xi32, #tpu.memory_space<smem>>) -> (i32, i32) {
    %c0_i32 = arith.constant 0 : i32
    %c0_i32_0 = arith.constant 0 : i32
    return %arg1, %c0_i32 : i32, i32
  }
  func.func @transform_2(%arg0: i32, %arg1: i32, %arg2: memref<1x3xi32, #tpu.memory_space<smem>>) -> (i32, i32) {
    %c0_i32 = arith.constant 0 : i32
    %c0_i32_0 = arith.constant 0 : i32
    return %c0_i32, %arg0 : i32, i32
  }
  func.func @transform_3(%arg0: i32, %arg1: i32, %arg2: memref<1x3xi32, #tpu.memory_space<smem>>) -> (i32, i32) {
    %c0_i32 = arith.constant 0 : i32
    return %arg1, %arg0 : i32, i32
  }
}

</mosaic_0001>

<bundles_post_ra>
// kernel: tpu_custom_call.1
= control target key start
LH: loop header
LB: loop body
LE: loop exit
PB: predicated region body
PF: predicated region fallthrough
CT: control target
= control target key end

     0   :  { %s1251_s0 = inlined_call_operand.vmem [shape: s32[1,3], index: 0, kind: input, shape index: {}]   ;;  %s1252_s1 = inlined_call_operand.vmem [shape: s32[16,1], index: 1, kind: input, shape index: {}]   ;;  %s1253_s2 = inlined_call_operand.vmem [shape: bf16[16,128], index: 2, kind: input, shape index: {}]   ;;  %s1254_s3 = inlined_call_operand.hbm [shape: bf16[128,384], index: 3, kind: input, shape index: {}]   ;;  %s1255_s4 = inlined_call_operand.hbm [shape: f32[16,384], index: 4, kind: output, shape index: {}]  }
   0x1   :  { %s9_s17 = sshll.u32 %s1251_s0, 4  ;;  %s10_s17 = int_to_ptr.vmem [resolvable:$true] %s9_s17 }
   0x2   :  { %s850_s18 = scalar_lea.vmem %s10_s17, 16  ;;  %p855_p1 = scmp.lt.s32.totalorder %s10_s17, %s10_s17 }
   0x3   :  { %p851_p0 = scmp.ne.s32.totalorder %s10_s17, %s850_s18  ;;  %p856_p2 = scmp.lt.s32.totalorder %s850_s18, %s850_s18 }
   0x5   :  { %p857_p3 = por %p856_p2, %p855_p1 }
   0x7   :  { %p858_p4 = pnand %p857_p3, %p851_p0 }
   0x9   :  { %861 = shalt.err (!%p858_p4)  }
   0xa   :  { %s978_s19 = smov [#allocation4]  }
   0xb   :  { %12 = dma.vmem_to_smem %s10_s17, 16, %s978_s19, [#allocation3] }
   0xc   :  { %944 = dma.done.wait [#allocation3], 16 }
   0xd   :  { %945 = vsyncadd [#allocation3], 4294967280 }
   0xe   :  { %14 = sfence }
   0xf   :  { %15 = vsyncpa [#allocation6], 0 }
  0x10   :  { %17 = vsyncpa [#allocation6 + $0x1], 0 }
  0x11   :  { %18 = vsyncpa [#allocation7], 0 }
  0x12   :  { %20 = vsyncpa [#allocation7 + $0x1], 0  ;;  %s1018_s20 = smov 0   ;;  %s1020_s0 = smov 0  }
  0x13   :  { %s1022_s21 = smov 0   ;;  %s1024_s22 = smov 0  }
  0x14   :  { %s1026_s23 = smov 0   ;;  %s1028_s24 = smov 0  }
  0x15 LB: > { %s661_s25 = sadd.s32 4294967295, %s976_s24   ;;  %s662_s26 = sadd.s32 4294967294, %s976_s24   ;;  %s976_s24 = sphi %s1028_s24, %s26_s24   ;;  %s972_s23 = sphi %s1026_s23, %s1268_s23   ;;  %s968_s22 = sphi %s1024_s22, %s1267_s22   ;;  %s964_s21 = sphi %s1022_s21, %s1266_s21   ;;  %s960_s0 = sphi %s1020_s0, %s1265_s0   ;;  %s956_s20 = sphi %s1018_s20, %s1264_s20  }
  0x16   : > { %s38_s27 = sadd.s32 1, %s972_s23  ;;  %s97_s28 = sadd.s32 1, %s964_s21 }
  0x17   : > { %p40_p5 = scmp.ge.s32.totalorder %s38_s27, 3  ;;  %p104_p6 = scmp.ne.s32.totalorder %s964_s21, %s960_s0 }
  0x18   : > { %p105_p7 = scmp.eq.s32.totalorder %s976_s24, 0  ;;  %p110_p8 = scmp.ne.s32.totalorder %s960_s0, %s956_s20 }
  0x19   : > { %s1270_s27 = smov (%p40_p5, %s38_s27), 0  ;;  %p111_p10 = scmp.eq.s32.totalorder %s661_s25, 0 }
  0x1a   : > { %p1059_p9 = por %p105_p7, %p104_p6  ;;  %s94_s30 = ssub.s32 %s972_s23, %s1270_s27 }
  0x1b   : > { %p136_p11 = scmp.eq.s32.totalorder %s661_s25, 2  ;;  %p95_p12 = scmp.eq.s32.totalorder %s94_s30, 0 }
  0x1c   : > { %p1065_p13 = por %p111_p10, %p110_p8  ;;  %p142_p1 = scmp.eq.s32.totalorder %s662_s26, 2 }
  0x1d   : > { %p1069_p0 = por %p136_p11, %p104_p6  ;;  %p772_p3 = scmp.lt.s32.totalorder %s976_s24, 3 }
  0x1e   : > { %s1074_s7 = scalar_select %p95_p12, %s964_s21, %s97_s28  }
  0x1f   : > { %s1259_s6 = scalar_select %p1069_p0, 1, 0 }
  0x20   : > { %p1076_p2 = por %p142_p1, %p110_p8  ;;  %s180_s9 = sand.u32 1, %s964_s21  }
  0x21   : > { %s667_s10 = sshll.u32 %s180_s9, 6  ;;  %s668_s11 = sshll.u32 %s972_s23, 6 }
  0x22   : > { %s1260_s8 = scalar_select %p1076_p2, 1, 0 }
  0x23   : > { %s1086_s14 = scalar_lea.hbm %s1254_s3, %s668_s11  ;;  %s184_s15 = scalar_lea.vmem [#allocation5], %s667_s10 }
  0x24   : > { %s190_s16 = sshll.u32 %s184_s15, 4  ;;  %p1092_p4 = pnand %p772_p3, %p1059_p9  ;;  %s1088_s16 = int_to_ptr.vmem [resolvable:$true] %s190_s16 }
  0x25   : > { %s1096_s18 = scalar_lea.sflag [#allocation6], %s180_s9  ;;  %s862_s19 = scalar_lea.hbm %s1086_s14, 1024 }
  0x26   : > { %p863_p5 = scmp.ne.s32.totalorder %s1086_s14, %s862_s19  ;;  %p864_p6 = pneg %p1092_p4 }
  0x27   : > { %s867_s28 = scalar_lea.hbm %s1254_s3, 3072  ;;  %p868_p9 = scmp.lt.u32.totalorder %s1086_s14, %s1254_s3 }
  0x28   : > { %p865_p7 = pnand %p864_p6, %p863_p5  ;;  %p869_p10 = scmp.lt.u32.totalorder %s867_s28, %s862_s19 }
  0x29   : > { %p871_p12 = scmp.lt.u32.totalorder %s862_s19, %s1086_s14 }
  0x2a   : > { %p866_p8 = pneg %p865_p7  ;;  %p870_p11 = por %p869_p10, %p868_p9 }
  0x2c   : > { %p872_p1 = por %p871_p12, %p870_p11 }
  0x2e   : > { %p873_p3 = pnand %p872_p1, %p866_p8 }
  0x30   : > { %876 = shalt.err (!%p873_p3)
}
  0x31   : > { %s877_s9 = scalar_lea.vmem %s1088_s16, 1024  ;;  %s979_s10 = smov [#allocation5]  }
  0x32   : > { %p878_p5 = scmp.ne.s32.totalorder %s1088_s16, %s877_s9  ;;  %s882_s11 = sshll.u32 %s979_s10, 4  ;;  %s883_s11 = int_to_ptr.vmem [resolvable:$false] %s882_s11 }
  0x33   : > { %s884_s12 = scalar_lea.vmem %s883_s11, 2048  ;;  %p885_p0 = scmp.lt.s32.totalorder %s1088_s16, %s883_s11 }
  0x34   : > { %p880_p7 = pnand %p878_p5, %p864_p6  ;;  %p886_p9 = scmp.lt.s32.totalorder %s884_s12, %s877_s9 }
  0x36   : > { %p881_p2 = pneg %p880_p7  ;;  %p887_p10 = por %p886_p9, %p885_p0 }
  0x38   : > { %p888_p11 = pnand %p887_p10, %p881_p2 }
  0x3a   : > { %891 = shalt.err (!%p888_p11)
}
  0x3b   : > { %s980_s13 = smov 192   ;;  %s981_s15 = smov 64  }
  0x3c   : > { %s982_s19 = smov 4   ;;  %p669_p6 = scmp.ge.s32.totalorder %s976_s24, 1 }
  0x3d   : > { %767 = dma.hbm_to_vmem [thread:$0]  (!%p1092_p4), %s1086_s14, 1024, %s1088_s16, %s1096_s18, %s980_s13, %s981_s15, %s982_s19  }
  0x3e   : > { %p198_p8 = scmp.lt.s32.totalorder %s976_s24, 4 }
  0x40   : > { %p199_p12 = pnand %p669_p6, %p198_p8 }
  0x41   : > { %s1127_s25 = sand.u32 (!%p199_p12), 1, %s960_s0  }
  0x42   : > { %202 = sbr.rel (%p199_p12) target bundleno = 389 (0x185), region = 32  ;;  %s670_s26 = sshll.u32 (!%p199_p12), %s1127_s25, 6 }
  0x43   : > { %s205_s28 = scalar_lea.sflag (!%p199_p12), [#allocation6], %s1127_s25  ;;  %s1131_s29 = scalar_lea.vmem (!%p199_p12), [#allocation5], %s670_s26 }
  0x49   : > { %947 = dma.done.wait (%p1065_p13), %s205_s28, 1024  }
  0x4a   : > { %949 = vsyncadd (%p1065_p13), %s205_s28, 4294966272  ;;  %s461_s14 = sshra.s32 %s968_s22, 7  ;;  %s466_s16 = sand.u32 127, %s968_s22  ;;  %v983_v0 = vmov 0.0   ;;  %vm984_vm0 = vmmov 0   ;;  %v832_v1 = vld [vmem:[%s1131_s29] sm:$0xff]  }
  0x4b   : > { %s682_s17 = sshll.u32 %s461_s14, 7  ;;  %s671_s18 = sshll.u32 %s1127_s25, 4  ;;  %740 = vmatprep.subr.bf16.mxu0 %v983_v0  ;;  %756 = vmatprep.mubr.msk.bf16.mxu0 %vm984_vm0, %v983_v0  ;;  %v833_v2 = vld [vmem:[%s1131_s29 + $0x8] sm:$0xff]   ;;  %v834_v3 = vld [vmem:[%s1131_s29 + $0x10] sm:$0xff]   ;;  %v693_v4 = vld [vmem:[%s1131_s29] sm:$0xff]  }
  0x4c   : > { %s467_s30 = sadd.s32 %s682_s17, %s466_s16  ;;  %741 = vmatpush3.bf16.msra.mxu0 %v832_v1  ;;  %v724_v5 = vld [vmem:[%s1131_s29 + $0x8] sm:$0xff]   ;;  %v835_v6 = vld [vmem:[%s1131_s29 + $0x18] sm:$0xff]   ;;  %v694_v7 = vunpack.c.l.bf16 %v693_v4  ;;  %v695_v8 = vunpack.c.h.bf16 %v693_v4  ;;  %v725_v10 = vld [vmem:[%s1131_s29 + $0x10] sm:$0xff]   ;;  %s1167_s11 = scalar_lea.vmem [#allocation8], %s671_s18 }
  0x4d   : > { %s1140_s5 = sld [smem:[#allocation4 + %s467_s30]]  ;;  %742 = vmatprep.subr.bf16.mxu0 %v983_v0  ;;  %v698_v9 = vunpack.c.l.bf16 %v724_v5  ;;  %v836_v11 = vld [vmem:[%s1131_s29 + $0x20] sm:$0xff]   ;;  %v699_v12 = vunpack.c.h.bf16 %v724_v5  ;;  %v702_v15 = vunpack.c.l.bf16 %v725_v10  ;;  %v726_v17 = vld [vmem:[%s1131_s29 + $0x18] sm:$0xff]   ;;  %v837_v18 = vld [vmem:[%s1131_s29 + $0x28] sm:$0xff]   ;;  %v703_v19 = vunpack.c.h.bf16 %v725_v10 }
  0x4e   : > { %v291_v13 = vmul.f32 %v694_v7, %v694_v7  ;;  %v292_v14 = vmul.f32 %v695_v8, %v695_v8  ;;  %v706_v22 = vunpack.c.l.bf16 %v726_v17  ;;  %v727_v25 = vld [vmem:[%s1131_s29 + $0x20] sm:$0xff]   ;;  %v838_v26 = vld [vmem:[%s1131_s29 + $0x30] sm:$0xff]   ;;  %v707_v27 = vunpack.c.h.bf16 %v726_v17  ;;  %v728_v33 = vld [vmem:[%s1131_s29 + $0x28] sm:$0xff]  }
  0x4f   : > { %v293_v16 = vmul.f32 %v698_v9, %v698_v9  ;;  %v294_v20 = vmul.f32 %v699_v12, %v699_v12  ;;  %v295_v23 = vmul.f32 %v702_v15, %v702_v15  ;;  %v296_v28 = vmul.f32 %v703_v19, %v703_v19  ;;  %v839_v34 = vld [vmem:[%s1131_s29 + $0x38] sm:$0xff]   ;;  %v729_v42 = vld [vmem:[%s1131_s29 + $0x30] sm:$0xff]  }
  0x50   : > { %743 = vmatpush3.bf16.msra.mxu0 %v833_v2  ;;  %v307_v21 = vadd.f32 %v292_v14, %v291_v13  ;;  %v710_v30 = vunpack.c.l.bf16 %v727_v25  ;;  %v297_v31 = vmul.f32 %v706_v22, %v706_v22  ;;  %v711_v35 = vunpack.c.h.bf16 %v727_v25  ;;  %v840_v41 = vld [vmem:[%s1253_s2] sm:$0xff]  }
  0x51   : > { %744 = vmatprep.subr.bf16.mxu0 %v983_v0  ;;  %v298_v36 = vmul.f32 %v707_v27, %v707_v27  ;;  %v714_v38 = vunpack.c.l.bf16 %v728_v33  ;;  %v715_v43 = vunpack.c.h.bf16 %v728_v33  ;;  %v718_v46 = vunpack.c.l.bf16 %v729_v42  ;;  %v730_v49 = vld [vmem:[%s1131_s29 + $0x38] sm:$0xff]  }
  0x52   : > { %v308_v24 = vadd.f32 %v307_v21, %v293_v16  ;;  %v299_v39 = vmul.f32 %v710_v30, %v710_v30  ;;  %v300_v44 = vmul.f32 %v711_v35, %v711_v35  ;;  %v719_v50 = vunpack.c.h.bf16 %v729_v42 }
  0x53   : > { %v301_v47 = vmul.f32 %v714_v38, %v714_v38  ;;  %v302_v51 = vmul.f32 %v715_v43, %v715_v43  ;;  %v722_v53 = vunpack.c.l.bf16 %v730_v49  ;;  %v303_v54 = vmul.f32 %v718_v46, %v718_v46  ;;  %p683_p13 = scmp.le.s32.totalorder %s1140_s5, 0 }
  0x54   : > { %745 = vmatpush3.bf16.msra.mxu0 %v834_v3  ;;  %v309_v29 = vadd.f32 %v308_v24, %v294_v20  ;;  %v723_v56 = vunpack.c.h.bf16 %v730_v49  ;;  %v304_v57 = vmul.f32 %v719_v50, %v719_v50  ;;  %v512_v22 = vld [vmem:[%s1252_s1] sm:$0xff] (!%p683_p13)  ;;  %v513_v24 = vld [vmem:[%s1252_s1 + $0x8] sm:$0xff] (!%p683_p13)  ;;  %s686_s26 = sshll.u32 (!%p683_p13), %s968_s22, 7 }
  0x55   : > { %746 = vmatprep.subr.bf16.mxu0 %v983_v0  ;;  %v305_v59 = vmul.f32 %v722_v53, %v722_v53 }
  0x56   : > { %v310_v32 = vadd.f32 %v309_v29, %v295_v23  ;;  %v306_v61 = vmul.f32 %v723_v56, %v723_v56  ;;  %v985_v23 = vmov (!%p683_p13), 0  }
  0x57   : > { %845 = vset.pattern.permute.xlu0 (!%p683_p13), %v985_v23 }
  0x58   : > { %747 = vmatpush3.bf16.msra.mxu0 %v835_v6  ;;  %v311_v37 = vadd.f32 %v310_v32, %v296_v28  ;;  %515 = vperm.xlu0 (!%p683_p13), %845, %v512_v22  }
  0x59   : > { %748 = vmatprep.subr.bf16.mxu0 %v983_v0 }
  0x5a   : > { %v312_v40 = vadd.f32 %v311_v37, %v297_v31 }
  0x5c   : > { %749 = vmatpush3.bf16.msra.mxu0 %v836_v11  ;;  %v313_v45 = vadd.f32 %v312_v40, %v298_v36  ;;  %518 = vperm.xlu0 (!%p683_p13), %845, %v513_v24  }
  0x5d   : > { %750 = vmatprep.subr.bf16.mxu0 %v983_v0 }
  0x5e   : > { %v314_v48 = vadd.f32 %v313_v45, %v299_v39 }
  0x60   : > { %751 = vmatpush3.bf16.msra.mxu0 %v837_v18  ;;  %v315_v52 = vadd.f32 %v314_v48, %v300_v44 }
  0x61   : > { %752 = vmatprep.subr.bf16.mxu0 %v983_v0 }
  0x62   : > { %v316_v55 = vadd.f32 %v315_v52, %v301_v47  ;;  %v510_v47 = vstv (!%p683_p13), %s686_s26 }
  0x64   : > { %753 = vmatpush3.bf16.msra.mxu0 %v838_v26  ;;  %v317_v58 = vadd.f32 %v316_v55, %v302_v51 }
  0x65   : > { %754 = vmatprep.subr.bf16.mxu0 %v983_v0 }
  0x66   : > { %v318_v60 = vadd.f32 %v317_v58, %v303_v54 }
  0x68   : > { %755 = vmatpush3.bf16.msra.mxu0 %v839_v34  ;;  %v319_v62 = vadd.f32 %v318_v60, %v304_v57 }
  0x6a   : > { %v320_v63 = vadd.f32 %v319_v62, %v305_v59 }
  0x6b   : > { %757 = vmatmul.mubr.bf16.vlgmr.msra.gmra.mrb[0].mxu0 %v840_v41  ;;  %v508_v41 = vlaneseq (!%p683_p13) }
  0x6c   : > { %v321_v0 = vadd.f32 %v320_v63, %v306_v61 }
  0x6d   : > { %v509_v46 = vand.u32 (!%p683_p13), 127, %v508_v41 }
  0x6e   : > { %v322_v1 = vrot.slane %v321_v0, 4 }
  0x6f   : > { %v511_v52 = vadd.s32 (!%p683_p13), %v510_v47, %v509_v46 }
  0x70   : > { %v323_v2 = vadd.f32 %v322_v1, %v321_v0 }
  0x72   : > { %v324_v3 = vrot.slane %v323_v2, 2 }
  0x74   : > { %v325_v4 = vadd.f32 %v324_v3, %v323_v2 }
  0x76   : > { %v326_v5 = vrot.slane %v325_v4, 1 }
  0x78   : > { %v327_v6 = vadd.f32 %v326_v5, %v325_v4 }
  0x7a   : > { %841 = vrsqrt.f32 %v327_v6  ;;  %vm330_vm1 = vcmp.eq.f32.partialorder %v327_v6, inf  ;;  %v333_v8 = vand.u32 2147483648, %v327_v6  ;;  %vm332_vm2 = vcmp.eq.f32.partialorder %v327_v6, 0.0 }
  0x84   : > { %v842_v7 = vpop.eup %841 }
  0x85   : > { %v329_v9 = vmul.f32 %v842_v7, %v327_v6 }
  0x87   : > { %v331_v10 = vsel %vm330_vm1, %v327_v6, %v329_v9 }
  0x88   : > { %v334_v11 = vsel %vm332_vm2, %v333_v8, %v331_v10 }
  0x89   : > { %v335_v12 = vmax.f32 %v334_v11, 1e-12 }
  0x8b   : > { %843 = vrcp.f32 %v335_v12 }
  0x95   : > { %v844_v13 = vpop.eup %843 }
  0x96   : > { %v337_v14 = vmul.f32 64.0, %v844_v13 }
  0x98   : > { %338 = vst [vmem:[#allocation2] sm:$0x1] %v337_v14 }
  0x9f   : > { %v681_v15 = vld [vmem:[#allocation2] ss:$0 sm:$0xff] }
  0xd7   : > { %v516_v56 = vpop.permute.xlu0 (!%p683_p13), %515 }
  0xd8   : > { %vm520_vm9 = vcmp.eq.s32.totalorder (!%p683_p13), %v511_v52, %v516_v56 }
  0xdb   : > { %v519_v59 = vpop.permute.xlu0 (!%p683_p13), %518 }
  0xdc   : > { %vm521_vm10 = vcmp.eq.s32.totalorder (!%p683_p13), %v511_v52, %v519_v59 }
 0x13b   : > { %472 = sbr.rel (%p683_p13) target bundleno = 353 (0x161), region = 44 }
 0x13e   : > { %v445_v16 = vpop.f32.mrb[0].mxu0 }
 0x13f   : > { %v1161_v17 = vmul.f32 %v681_v15, %v445_v16  ;;  %v758_v18 = vpop.f32.mrb[1].mxu0 }
 0x140   : > { %v448_v19 = vpop.f32.mrb[2].mxu0 }
 0x141   : > { %v1163_v20 = vmul.f32 %v681_v15, %v448_v19  ;;  %v759_v21 = vpop.f32.mrb[3].mxu0  ;;  %v473_v25 = vmul.f32 (!%p683_p13), %v1161_v17, %v1161_v17  ;;  %v495_v43 = vmul.f32 (!%p683_p13), 0.87758255, %v1161_v17  ;;  %v684_v49 = vadd.f32 (!%p683_p13), -15.341618, %v1161_v17 }
 0x142   : > { %vm501_vm7 = vcmp.gt.f32.partialorder %v1161_v17, -56.165283 }
 0x143   : > { %v475_v26 = vsub.f32 4096.0, %v473_v25  ;;  %v474_v27 = vmul.f32 %v1163_v20, %v1163_v20  ;;  %v496_v50 = vmul.f32 0.87758255, %v1163_v20  ;;  %v685_v55 = vadd.f32 -15.341618, %v1163_v20 }
 0x144   : > { %vm502_vm8 = vcmp.gt.f32.partialorder %v1163_v20, -56.165283 }
 0x145   : > { %v477_v28 = vmax.f32 %v475_v26, 0.0  ;;  %v476_v29 = vsub.f32 4096.0, %v474_v27 }
 0x147   : > { %v479_v30 = vmin.f32 %v477_v28, 4096.0  ;;  %v478_v31 = vmax.f32 %v476_v29, 0.0 }
 0x149   : > { %846 = vrsqrt.f32 %v479_v30  ;;  %v480_v32 = vmin.f32 %v478_v31, 4096.0  ;;  %vm483_vm3 = vcmp.eq.f32.partialorder %v479_v30, inf  ;;  %v486_v36 = vand.u32 2147483648, %v479_v30 }
 0x14a   : > { %vm485_vm4 = vcmp.eq.f32.partialorder %v479_v30, 0.0 }
 0x14b   : > { %848 = vrsqrt.f32 %v480_v32  ;;  %vm490_vm5 = vcmp.eq.f32.partialorder %v480_v32, inf  ;;  %v493_v40 = vand.u32 2147483648, %v480_v32  ;;  %vm492_vm6 = vcmp.eq.f32.partialorder %v480_v32, 0.0 }
 0x153   : > { %v847_v33 = vpop.eup %846 }
 0x154   : > { %v482_v34 = vmul.f32 %v847_v33, %v479_v30 }
 0x155   : > { %v849_v35 = vpop.eup %848 }
 0x156   : > { %v484_v37 = vsel %vm483_vm3, %v479_v30, %v482_v34  ;;  %v489_v38 = vmul.f32 %v849_v35, %v480_v32 }
 0x157   : > { %v487_v39 = vsel %vm485_vm4, %v486_v36, %v484_v37 }
 0x158   : > { %v491_v42 = vsel %vm490_vm5, %v480_v32, %v489_v38  ;;  %v497_v44 = vmul.f32 0.47942555, %v487_v39 }
 0x159   : > { %v494_v45 = vsel %vm492_vm6, %v493_v40, %v491_v42 }
 0x15a   : > { %v499_v48 = vsub.f32 %v495_v43, %v497_v44  ;;  %v498_v51 = vmul.f32 0.47942555, %v494_v45 }
 0x15c   : > { %v505_v53 = vsel %vm501_vm7, %v499_v48, %v684_v49  ;;  %v500_v54 = vsub.f32 %v496_v50, %v498_v51 }
 0x15d   : > { %v522_v57 = vsel %vm520_vm9, %v505_v53, %v1161_v17 }
 0x15e   : > { %524 = vst [vmem:[%s1167_s11] sm:$0xff] %v522_v57  ;;  %v506_v58 = vsel %vm502_vm8, %v500_v54, %v685_v55 }
 0x15f   : > { %v523_v60 = vsel %vm521_vm10, %v506_v58, %v1163_v20 }
 0x160   : > { %525 = vst [vmem:[%s1167_s11 + $0x8] sm:$0xff] %v523_v60 }
 0x161 PF: > { %p687_p0 = scmp.gt.s32.totalorder %s1140_s5, 0 }
 0x162   : > { %530 = vst [vmem:[%s1167_s11] sm:$0xff] (!%p687_p0), %v1161_v17  ;;  %531 = vst [vmem:[%s1167_s11 + $0x8] sm:$0xff] (!%p687_p0), %v1163_v20 }
 0x163   : > { %529 = sbr.rel (%p687_p0) target bundleno = 362 (0x16a), region = 48 }
 0x16a PF: > { %s689_s28 = sshll.u32 %s968_s22, 7  ;;  %s548_s17 = sshll.u32 %s1167_s11, 4  ;;  %s1203_s17 = int_to_ptr.vmem [resolvable:$true] %s548_s17 }
 0x16b   : > { %s1200_s16 = scalar_lea.hbm %s1255_s4, %s689_s28  ;;  %s533_s18 = scalar_lea.sflag [#allocation7], %s1127_s25 }
 0x16c   : > { %s892_s30 = scalar_lea.vmem %s1203_s17, 256  ;;  %p1262_p4 = scmp.ne.s32.totalorder %s1259_s6, 0 }
 0x16d   : > { %p893_p2 = scmp.ne.s32.totalorder %s1203_s17, %s892_s30  ;;  %s986_s5 = smov [#allocation8]  }
 0x16e   : > { %s896_s9 = sshll.u32 %s986_s5, 4  ;;  %s897_s9 = int_to_ptr.vmem [resolvable:$false] %s896_s9 }
 0x16f   : > { %p894_p1 = pnand %p893_p2, %p1262_p4  ;;  %s898_s22 = scalar_lea.vmem %s897_s9, 512 }
 0x170   : > { %p899_p5 = scmp.lt.s32.totalorder %s1203_s17, %s897_s9  ;;  %p900_p7 = scmp.lt.s32.totalorder %s898_s22, %s892_s30 }
 0x171   : > { %p895_p3 = pneg %p894_p1 }
 0x172   : > { %p901_p9 = por %p900_p7, %p899_p5 }
 0x174   : > { %p902_p10 = pnand %p901_p9, %p895_p3 }
 0x176   : > { %905 = shalt.err (!%p902_p10)
}
 0x177   : > { %s906_s10 = scalar_lea.hbm %s1200_s16, 256  ;;  %s910_s13 = scalar_lea.hbm %s1255_s4, 768 }
 0x178   : > { %p907_p11 = scmp.ne.s32.totalorder %s1200_s16, %s906_s10  ;;  %p911_p12 = scmp.lt.u32.totalorder %s1200_s16, %s1255_s4 }
 0x179   : > { %p912_p13 = scmp.lt.u32.totalorder %s910_s13, %s906_s10  ;;  %p914_p2 = scmp.lt.u32.totalorder %s906_s10, %s1200_s16 }
 0x17a   : > { %p908_p6 = pnand %p907_p11, %p1262_p4 }
 0x17b   : > { %p913_p0 = por %p912_p13, %p911_p12 }
 0x17c   : > { %p909_p8 = pneg %p908_p6 }
 0x17d   : > { %p915_p1 = por %p914_p2, %p913_p0 }
 0x17f   : > { %p916_p3 = pnand %p915_p1, %p909_p8 }
 0x181   : > { %919 = shalt.err (!%p916_p3)
}
 0x182   : > { %s987_s26 = smov 128   ;;  %s988_s28 = smov 384  }
 0x183   : > { %s989_s29 = smov 8  }
 0x184   : > { %762 = dma.vmem_to_hbm [thread:$0]  (%p1262_p4), %s1203_s17, 256, %s1200_s16, %s533_s18, %s987_s26, %s988_s28, %s989_s29  }
 0x185 PF: > { %p773_p5 = scmp.ge.s32.totalorder %s976_s24, 2  ;;  %s563_s14 = sand.u32 1, %s956_s20  }
 0x186   : > { %p1263_p7 = scmp.ne.s32.totalorder %s1260_s8, 0  ;;  %s564_s30 = scalar_lea.sflag [#allocation7], %s563_s14 }
 0x188   : > { %p769_p9 = pnand %p773_p5, %p1263_p7 }
 0x18a   : > { %951 = dma.done.wait (!%p769_p9), %s564_s30, 256  }
 0x18b   : > { %953 = vsyncadd (!%p769_p9), %s564_s30, 4294967040  ;;  %s26_s24 = sadd.s32 1, %s976_s24   ;;  %s1264_s20 = smov %s960_s0 }
 0x18c   : > { %p23_p10 = scmp.ge.s32.totalorder %s26_s24, 5   ;;  %s1265_s0 = smov %s964_s21 }
 0x18d   : > { %s1266_s21 = smov %s1074_s7  ;;  %s1267_s22 = smov %s972_s23 }
 0x18e   : > { %s1268_s23 = smov %s1270_s27  ;;  %25 = sbr.rel (!%p23_p10) target bundleno = 21 (0x15), region = 95 }
 0x195   :  { %569 = vsyncpa [#allocation6], 1 }
 0x196   :  { %571 = vsyncpa [#allocation6 + $0x1], 1 }
 0x197   :  { %572 = vsyncpa [#allocation7], 1 }
 0x198   :  { %574 = vsyncpa [#allocation7 + $0x1], 1 }

</bundles_post_ra>
